<compile_context>
chip_gen: v7x
topology: tpu7x:2x2x1
jax: 0.10.0
libtpu: 0.0.40
codegen_flags: <defaults>
</compile_context>

<pallas_src>
import jax
import jax.numpy as jnp
from jax.experimental import pallas as pl
from jax.experimental.pallas import tpu as pltpu


def _round_up(x: int, m: int) -> int:
    return ((x + m - 1) // m) * m


# ---------------------------------------------------------------------------
# Kernels
# ---------------------------------------------------------------------------
def _classifier_kernel_masked(x_ref, w_ref, b_ref, k_ref, o_ref):
    # x_ref: (tm, H) native dtype  w_ref: (H, tn) bf16
    # b_ref: (1, tn) f32           k_ref: (tm, 1) f32 (1.0 = keep, 0.0 = padded row)
    xt = x_ref[...].astype(w_ref.dtype)                    # in-kernel cast (VPU)
    y = jnp.dot(xt, w_ref[...], preferred_element_type=jnp.float32)
    y = (y + b_ref[...]) * k_ref[...]                      # bias, then masked_fill_(mask, 0)
    o_ref[...] = y.astype(o_ref.dtype)


def _classifier_kernel_nomask(x_ref, w_ref, b_ref, o_ref):
    xt = x_ref[...].astype(w_ref.dtype)
    y = jnp.dot(xt, w_ref[...], preferred_element_type=jnp.float32)
    y = y + b_ref[...]
    o_ref[...] = y.astype(o_ref.dtype)


# ---------------------------------------------------------------------------
# Parameter prep (do this once at parameter-load time, NOT per forward call)
# ---------------------------------------------------------------------------
def prepare_classifier_params(weight, bias, *, compute_dtype=jnp.bfloat16):
    """weight: (C, H) PyTorch nn.Linear layout; bias: (C,).

    Returns (w_hc, b_1c, C): weight transposed to (H, Cp) with the class dim
    padded only to the next multiple of 128 (lane-dense), cast to compute_dtype;
    bias padded to (1, Cp) in f32.
    """
    C, H = weight.shape
    Cp = _round_up(C, 128)
    w_hc = jnp.zeros((H, Cp), compute_dtype).at[:, :C].set(
        weight.T.astype(compute_dtype))
    b_1c = jnp.zeros((1, Cp), jnp.float32).at[:, :C].set(
        bias.astype(jnp.float32)[None, :])
    return w_hc, b_1c, C


# ---------------------------------------------------------------------------
# Tile selection / VMEM budgeting
# ---------------------------------------------------------------------------
def _vmem_capacity_bytes() -> int:
    try:
        return int(pltpu.get_tpu_info().vmem_capacity_bytes)
    except Exception:
        return 64 * 1024 * 1024          # conservative (v7x per-core) fallback


def _pick_tiles(M, H, Cp, x_bytes, w_bytes, out_bytes, masked, budget,
                tm_cap, tn_cap):
    """Pick (tm, tn, double_buffered_footprint) under the VMEM budget."""
    # tn candidates: multiples of 128 that divide Cp (Cp is a multiple of 128,
    # so tn=128 always qualifies) — never inflates the padded class dim.
    tn_opts = [t for t in range(min(tn_cap, Cp), 0, -128) if Cp % t == 0]
    if not tn_opts:
        tn_opts = [Cp]

    tm = max(8, min(tm_cap, _round_up(M, 8)))
    tn_idx = 0
    tn = tn_opts[tn_idx]

    def foot(tm_, tn_):
        per = (tm_ * H * x_bytes            # x tile (native dtype)
               + H * tn_ * w_bytes          # weight tile
               + tn_ * 4                    # bias tile
               + (tm_ * 4 if masked else 0)  # keep tile
               + tm_ * tn_ * out_bytes)     # output tile
        return 2 * per                      # double-buffered

    while foot(tm, tn) > budget:
        w_part = 2 * H * tn * w_bytes
        x_part = 2 * (tm * H * x_bytes + tm * tn * out_bytes)
        can_tm = tm > 8
        can_tn = tn_idx + 1 < len(tn_opts)
        if can_tn and (w_part >= x_part or not can_tm):
            tn_idx += 1
            tn = tn_opts[tn_idx]
        elif can_tm:
            tm = max(8, _round_up(tm // 2, 8))
        else:
            break
    return tm, tn, foot(tm, tn)


# ---------------------------------------------------------------------------
# Forward
# ---------------------------------------------------------------------------
def mask_aware_classifier_apply(x, params, padding_masks=None, *,
                                tm_cap=512, tn_cap=1024):
    """x: (B, S, H); params from prepare_classifier_params; padding_masks: (B, S).

    Returns (B, S, C) in x.dtype. bf16 MXU operands with f32 accumulation;
    bias add and masking in f32.
    """
    w_hc, b_1c, C = params
    B, S, H = x.shape
    assert w_hc.shape[0] == H, "hidden_size mismatch between x and weight"
    Cp = w_hc.shape[1]
    M = B * S
    out_dtype = x.dtype
    masked = padding_masks is not None

    x_bytes = jnp.dtype(x.dtype).itemsize
    w_bytes = jnp.dtype(w_hc.dtype).itemsize
    out_bytes = jnp.dtype(out_dtype).itemsize

    vmem_cap = _vmem_capacity_bytes()
    budget = (vmem_cap * 3) // 4            # leave headroom for compiler scratch
    tm, tn, foot = _pick_tiles(M, H, Cp, x_bytes, w_bytes, out_bytes, masked,
                               budget, tm_cap, tn_cap)

    # Row tiling: a single full-extent row block avoids any padding of x.
    if tm >= M:
        tm = M
        Mp = M
    else:
        Mp = _round_up(M, tm)

    x2 = x.reshape(M, H)                    # free reshape, native dtype (no astype)
    if Mp != M:
        x2 = jnp.pad(x2, ((0, Mp - M), (0, 0)))

    n_row = Mp // tm
    n_col = Cp // tn

    # Adaptive grid order: make the dominant HBM stream the one that is read
    # exactly once (outer axis), the smaller one is re-streamed per inner step.
    bytes_row_outer = n_row * H * Cp * w_bytes + Mp * H * x_bytes   # W re-streamed
    bytes_col_outer = n_col * Mp * H * x_bytes + H * Cp * w_bytes   # x re-streamed
    class_outer = bytes_col_outer <= bytes_row_outer

    if class_outer:
        grid = (n_col, n_row)
        x_map = lambda j, i: (i, 0)
        w_map = lambda j, i: (0, j)
        b_map = lambda j, i: (0, j)
        k_map = lambda j, i: (i, 0)
        o_map = lambda j, i: (i, j)
        streamed_in_bytes = bytes_col_outer
    else:
        grid = (n_row, n_col)
        x_map = lambda i, j: (i, 0)
        w_map = lambda i, j: (0, j)
        b_map = lambda i, j: (0, j)
        k_map = lambda i, j: (i, 0)
        o_map = lambda i, j: (i, j)
        streamed_in_bytes = bytes_row_outer

    operands = [x2, w_hc, b_1c]
    in_specs = [
        pl.BlockSpec((tm, H), x_map),       # row tile of x (full H extent)
        pl.BlockSpec((H, tn), w_map),       # class tile of weight
        pl.BlockSpec((1, tn), b_map),       # class tile of bias
    ]
    if masked:
        keep = 1.0 - padding_masks.reshape(M, 1).astype(jnp.float32)
        if Mp != M:
            keep = jnp.pad(keep, ((0, Mp - M), (0, 0)))
        operands.append(keep)
        in_specs.append(pl.BlockSpec((tm, 1), k_map))
        kernel = _classifier_kernel_masked
    else:
        kernel = _classifier_kernel_nomask

    # VMEM limit: actual double-buffered footprint + headroom, clamped below
    # the physical per-core capacity for this generation.
    vmem_limit = int(min(max(foot + 4 * 1024 * 1024, 32 * 1024 * 1024),
                         (vmem_cap * 7) // 8))

    cost = pl.CostEstimate(
        flops=2 * Mp * H * Cp,
        transcendentals=0,
        bytes_accessed=int(streamed_in_bytes
                           + Mp * Cp * out_bytes
                           + (Mp * 4 if masked else 0)
                           + Cp * 4),
    )

    out = pl.pallas_call(
        kernel,
        out_shape=jax.ShapeDtypeStruct((Mp, Cp), out_dtype),
        grid_spec=pltpu.PrefetchScalarGridSpec(
            num_scalar_prefetch=0,
            grid=grid,
            in_specs=in_specs,
            out_specs=pl.BlockSpec((tm, tn), o_map),
        ),
        compiler_params=pltpu.CompilerParams(
            dimension_semantics=("parallel", "parallel"),
            vmem_limit_bytes=vmem_limit,
        ),
        cost_estimate=cost,
    )(*operands)

    # TODO(synk): for very large C a consumer that can mask padded classes could
    #             take the Cp-padded output directly and skip this slice pass.
    if Mp != M or Cp != C:
        out = out[:M, :C]
    return out.reshape(B, S, C)


def mask_aware_classifier(x, weight, bias, padding_masks=None, *,
                          tm_cap=512, tn_cap=1024,
                          compute_dtype=jnp.bfloat16):
    """Convenience wrapper matching the PyTorch module signature.

    Prefer prepare_classifier_params() once + mask_aware_classifier_apply() per step.
    """
    params = prepare_classifier_params(weight, bias, compute_dtype=compute_dtype)
    return mask_aware_classifier_apply(x, params, padding_masks,
                                       tm_cap=tm_cap, tn_cap=tn_cap)


if __name__ == "__main__":
    # Small shapes consistent with the module: batch=2, seq=8, hidden=32, n_classes=16.
    B, S, H, C = 2, 8, 32, 16
    key = jax.random.PRNGKey(0)
    kx, kw, kb, km = jax.random.split(key, 4)

    x = jax.random.normal(kx, (B, S, H), dtype=jnp.float32)
    weight = jax.random.normal(kw, (C, H), dtype=jnp.float32) * 0.1   # nn.Linear (C, H)
    bias = jax.random.normal(kb, (C,), dtype=jnp.float32) * 0.1
    padding_masks = jax.random.bernoulli(km, p=0.3, shape=(B, S))     # True = padded

    # Prepare parameters once (transpose + pad + bf16 cast).
    params = prepare_classifier_params(weight, bias)

    out_masked = jax.block_until_ready(
        mask_aware_classifier_apply(x, params, padding_masks))
    out_nomask = jax.block_until_ready(
        mask_aware_classifier_apply(x, params, None))

    # Reference (plain JAX) with matching bf16 operand rounding, f32 accumulation.
    xb = x.astype(jnp.bfloat16).astype(jnp.float32)
    wb = weight.astype(jnp.bfloat16).astype(jnp.float32)
    ref = jnp.einsum("bsh,ch->bsc", xb, wb,
                     precision=jax.lax.Precision.HIGHEST) + bias
    ref_masked = jnp.where(padding_masks[..., None], 0.0, ref)

    assert out_masked.shape == (B, S, C)
    assert out_nomask.shape == (B, S, C)
    assert jnp.allclose(out_masked, ref_masked, atol=1e-3, rtol=1e-3)
    assert jnp.allclose(out_nomask, ref, atol=1e-3, rtol=1e-3)

    print("KERNEL_OK")
</pallas_src>

<mosaic_0001>
module attributes {stable_mosaic.version = 11 : i64} {
  func.func @_classifier_kernel_masked(%arg0: i32, %arg1: i32, %arg2: memref<16x32xf32, #tpu.memory_space<vmem>>, %arg3: memref<32x128xbf16, #tpu.memory_space<vmem>>, %arg4: memref<1x128xf32, #tpu.memory_space<vmem>>, %arg5: memref<16x1xf32, #tpu.memory_space<vmem>>, %arg6: memref<16x128xf32, #tpu.memory_space<vmem>>) attributes {dimension_semantics = [#tpu.dimension_semantics<parallel>, #tpu.dimension_semantics<parallel>], iteration_bounds = array<i64: 1, 1>, scalar_prefetch = 0 : i64, scratch_operands = 0 : i64, tpu.core_type = #tpu.core_type<tc>, window_params = [{transform_indices = @transform_0, window_bounds = array<i64: 16, 32>}, {transform_indices = @transform_1, window_bounds = array<i64: 32, 128>}, {transform_indices = @transform_2, window_bounds = array<i64: 1, 128>}, {transform_indices = @transform_3, window_bounds = array<i64: 16, 1>}, {transform_indices = @transform_4, window_bounds = array<i64: 16, 128>}]} {
    %c0 = arith.constant 0 : index
    %c0_0 = arith.constant 0 : index
    %0 = vector.load %arg2[%c0, %c0_0] : memref<16x32xf32, #tpu.memory_space<vmem>>, vector<16x32xf32>
    %1 = arith.truncf %0 : vector<16x32xf32> to vector<16x32xbf16>
    %c0_1 = arith.constant 0 : index
    %c0_2 = arith.constant 0 : index
    %2 = vector.load %arg3[%c0_1, %c0_2] : memref<32x128xbf16, #tpu.memory_space<vmem>>, vector<32x128xbf16>
    %cst = arith.constant dense<0.000000e+00> : vector<16x128xf32>
    %3 = tpu.matmul %1, %2, %cst {dimension_numbers = #tpu.dot_dimension_numbers<[1], [0], [0], [1], [0, 0, 1, 1], [], []>} : vector<16x32xbf16>, vector<32x128xbf16>, vector<16x128xf32> -> vector<16x128xf32>
    %c0_3 = arith.constant 0 : index
    %c0_4 = arith.constant 0 : index
    %4 = vector.load %arg4[%c0_3, %c0_4] : memref<1x128xf32, #tpu.memory_space<vmem>>, vector<1x128xf32>
    %5 = vector.broadcast %4 : vector<1x128xf32> to vector<16x128xf32>
    %6 = arith.addf %3, %5 : vector<16x128xf32>
    %c0_5 = arith.constant 0 : index
    %c0_6 = arith.constant 0 : index
    %7 = vector.load %arg5[%c0_5, %c0_6] : memref<16x1xf32, #tpu.memory_space<vmem>>, vector<16x1xf32>
    %8 = vector.broadcast %7 : vector<16x1xf32> to vector<16x128xf32>
    %9 = arith.mulf %6, %8 : vector<16x128xf32>
    %c0_7 = arith.constant 0 : index
    %c0_8 = arith.constant 0 : index
    %10 = vector.load %arg6[%c0_7, %c0_8] : memref<16x128xf32, #tpu.memory_space<vmem>>, vector<16x128xf32>
    tpu.vector_store %arg6[%c0_7, %c0_8], %9 {strides = array<i32>} : memref<16x128xf32, #tpu.memory_space<vmem>>, vector<16x128xf32>,
    return
  }
  func.func @transform_0(%arg0: i32, %arg1: i32) -> (i32, i32) {
    %c0_i32 = arith.constant 0 : i32
    %c0_i32_0 = arith.constant 0 : i32
    return %arg1, %c0_i32 : i32, i32
  }
  func.func @transform_1(%arg0: i32, %arg1: i32) -> (i32, i32) {
    %c0_i32 = arith.constant 0 : i32
    %c0_i32_0 = arith.constant 0 : i32
    return %c0_i32, %arg0 : i32, i32
  }
  func.func @transform_2(%arg0: i32, %arg1: i32) -> (i32, i32) {
    %c0_i32 = arith.constant 0 : i32
    %c0_i32_0 = arith.constant 0 : i32
    return %c0_i32, %arg0 : i32, i32
  }
  func.func @transform_3(%arg0: i32, %arg1: i32) -> (i32, i32) {
    %c0_i32 = arith.constant 0 : i32
    %c0_i32_0 = arith.constant 0 : i32
    return %arg1, %c0_i32 : i32, i32
  }
  func.func @transform_4(%arg0: i32, %arg1: i32) -> (i32, i32) {
    %c0_i32 = arith.constant 0 : i32
    return %arg1, %arg0 : i32, i32
  }
}

</mosaic_0001>

<bundles_post_ra>
// kernel: tpu_custom_call.1
= control target key start
LH: loop header
LB: loop body
LE: loop exit
PB: predicated region body
PF: predicated region fallthrough
CT: control target
= control target key end

     0   :  { %9 = vsyncpa [#allocation3], 0  ;;  %s285_s0 = inlined_call_operand.vmem [shape: f32[16,32], index: 0, kind: input, shape index: {}]   ;;  %s286_s1 = inlined_call_operand.hbm [shape: bf16[32,128], index: 1, kind: input, shape index: {}]   ;;  %s287_s2 = inlined_call_operand.vmem [shape: f32[1,128], index: 2, kind: input, shape index: {}]   ;;  %s288_s3 = inlined_call_operand.vmem [shape: f32[16,1], index: 3, kind: input, shape index: {}]   ;;  %s289_s4 = inlined_call_operand.hbm [shape: f32[16,128], index: 4, kind: output, shape index: {}]  }
   0x1   :  { %10 = vsyncpa [#allocation4], 0  ;;  %s212_s15 = smov [#allocation2]   ;;  %s164_s19 = scalar_lea.hbm %s286_s1, 256 }
   0x2   :  { %s18_s16 = sshll.u32 %s212_s15, 4  ;;  %p165_p0 = scmp.ne.s32.totalorder %s286_s1, %s164_s19  ;;  %s19_s16 = int_to_ptr.vmem [resolvable:$true] %s18_s16 }
   0x3   :  { %p168_p1 = scmp.lt.u32.totalorder %s164_s19, %s286_s1 }
   0x5   :  { %p170_p2 = pnand %p168_p1, %p165_p0 }
   0x7   :  { %173 = shalt.err (!%p170_p2)
}
   0x8   :  { %s174_s24 = scalar_lea.vmem %s19_s16, 256  ;;  %p179_p4 = scmp.lt.s32.totalorder %s19_s16, %s19_s16 }
   0x9   :  { %p175_p3 = scmp.ne.s32.totalorder %s19_s16, %s174_s24  ;;  %p180_p5 = scmp.lt.s32.totalorder %s174_s24, %s174_s24 }
   0xb   :  { %p181_p6 = por %p180_p5, %p179_p4 }
   0xd   :  { %p182_p7 = pnand %p181_p6, %p175_p3 }
   0xf   :  { %185 = shalt.err (!%p182_p7)
}
  0x10   :  { %s213_s25 = smov 64   ;;  %s214_s26 = smov 4  }
  0x11   :  { %24 = dma.hbm_to_vmem [thread:$0]  %s286_s1, 256, %s19_s16, [#allocation3], %s213_s25, %s213_s25, %s214_s26  }
  0x12   :  { %208 = dma.done.wait [#allocation3], 256  }
  0x13   :  { %209 = vsyncadd [#allocation3], 4294967040  ;;  %v215_v0 = vmov 0.0   ;;  %vm216_vm0 = vmmov 0   ;;  %v217_v1 = vmov 0   ;;  %v162_v2 = vld [vmem:[#allocation2] sm:$0xff]  }
  0x14   :  { %144 = vmatprep.subr.bf16.mxu0 %v215_v0  ;;  %148 = vmatprep.mubr.msk.bf16.mxu0 %vm216_vm0, %v215_v0  ;;  %v163_v3 = vld [vmem:[#allocation2 + $0x8] sm:$0xff]   ;;  %v33_v4 = vld [vmem:[%s285_s0] sm:$0xff]  ;;  %vm59_vm1 = vcmask 261120  }
  0x15   :  { %161 = vset.pattern.permute.xlu0 %v217_v1  ;;  %145 = vmatpush3.bf16.msra.mxu0 %v162_v2  ;;  %v34_v5 = vld [vmem:[%s285_s0 + $0x8] sm:$0xff]  ;;  %v104_v6 = vld [vmem:[%s288_s3] sm:$0xff]  ;;  %s218_s0 = smov [#allocation5]  }
  0x16   :  { %146 = vmatprep.subr.bf16.mxu0 %v215_v0  ;;  %108 = vperm.xlu0 %161, %v104_v6   ;;  %v105_v7 = vld [vmem:[%s288_s3 + $0x8] sm:$0xff]  ;;  %v35_v8 = vpack.c.bf16 %v34_v5, %v33_v4  ;;  %v137_v10 = vld [vmem:[%s287_s2] ss:$0 sm:$0xff]  ;;  %s125_s12 = sshll.u32 %s218_s0, 4  ;;  %s126_s12 = int_to_ptr.vmem [resolvable:$true] %s125_s12 }
  0x17   :  { %s186_s3 = scalar_lea.vmem %s126_s12, 256  ;;  %p191_p9 = scmp.lt.s32.totalorder %s126_s12, %s126_s12 }
  0x18   :  { %p187_p8 = scmp.ne.s32.totalorder %s126_s12, %s186_s3  ;;  %p192_p10 = scmp.lt.s32.totalorder %s186_s3, %s186_s3 }
  0x19   :  { %147 = vmatpush3.bf16.msra.mxu0 %v163_v3 }
  0x1a   :  { %113 = vperm.xlu0 %161, %v105_v7   ;;  %p193_p11 = por %p192_p10, %p191_p9 }
  0x1c   :  { %149 = vmatmul.mubr.msk.bf16.vlgmr.msra.gmra.mrb[0].mxu0 %vm59_vm1, %v35_v8  ;;  %p194_p12 = pnand %p193_p11, %p187_p8 }
  0x95   :  { %v109_v9 = vpop.permute.xlu0 %108 }
  0x99   :  { %v114_v18 = vpop.permute.xlu0 %113 }
  0xef   :  { %v97_v11 = vpop.f32.mrb[0].mxu0 }
  0xf0   :  { %v98_v12 = vadd.f32 %v137_v10, %v97_v11  ;;  %v150_v13 = vpop.f32.mrb[1].mxu0 }
  0xf1   :  { %v100_v14 = vpop.f32.mrb[2].mxu0 }
  0xf2   :  { %v116_v15 = vmul.f32 %v109_v9, %v98_v12  ;;  %v101_v16 = vadd.f32 %v137_v10, %v100_v14  ;;  %v151_v17 = vpop.f32.mrb[3].mxu0 }
  0xf4   :  { %118 = vst [vmem:[#allocation5] sm:$0xff] %v116_v15  ;;  %v117_v19 = vmul.f32 %v114_v18, %v101_v16 }
  0xf6   :  { %119 = vst [vmem:[#allocation5 + $0x8] sm:$0xff] %v117_v19 }
  0xf7   :  { %197 = shalt.err (!%p194_p12)
}
  0xf8   :  { %s198_s14 = scalar_lea.hbm %s289_s4, 256 }
  0xf9   :  { %p199_p13 = scmp.ne.s32.totalorder %s289_s4, %s198_s14  ;;  %p202_p0 = scmp.lt.u32.totalorder %s198_s14, %s289_s4 }
  0xfb   :  { %p204_p1 = pnand %p202_p0, %p199_p13 }
  0xfd   :  { %207 = shalt.err (!%p204_p1)
}
  0xfe   :  { %s219_s19 = smov 128   ;;  %s220_s20 = smov 8  }
  0xff   :  { %131 = dma.vmem_to_hbm [thread:$0]  %s126_s12, 256, %s289_s4, [#allocation4], %s219_s19, %s219_s19, %s220_s20  }
 0x100   :  { %210 = dma.done.wait [#allocation4], 256  }
 0x101   :  { %211 = vsyncadd [#allocation4], 4294967040 }
 0x102   :  { %135 = vsyncpa [#allocation3], 1 }
 0x103   :  { %136 = vsyncpa [#allocation4], 1 }

</bundles_post_ra>
